<compile_context>
chip_gen: v7x
topology: tpu7x:2x2x1
jax: 0.10.0
libtpu: 0.0.40
codegen_flags: <defaults>
</compile_context>

<pallas_src>
import functools

import jax
import jax.numpy as jnp
from jax import lax
from jax.experimental import pallas as pl
from jax.experimental.pallas import tpu as pltpu

LEAKY_SLOPE = 0.01  # nn.LeakyReLU default
BN_EPS = 0.001      # module default
LANE = 128          # vreg lane width
SUBLANE = 8         # vreg sublane count (f32)


def _round_up(x, m):
    return (x + m - 1) // m * m


# ---------------------------------------------------------------------------
# Fused decoder kernel (one grid point = one batch tile)
# ---------------------------------------------------------------------------
def decoder_kernel(x_ref, w0_ref, b0_ref, wf_ref, bf_ref, wo_ref, bo_ref,
                   o_ref, *, n_shared):
    """o = Linear_out( lrelu-block^(n_shared)( lrelu-block_0(x) ) )

    BN is folded into (w, b); leaky_relu(y) == max(y, slope*y) for slope < 1.
    Matmuls run in bf16 on the MXU with f32 accumulation; activation math in
    f32, recast to bf16 between layers.
    """
    def block(h_bf16, w_bf16, bias_f32):
        y = jnp.dot(h_bf16, w_bf16, preferred_element_type=jnp.float32) + bias_f32
        y = jnp.maximum(y, LEAKY_SLOPE * y)
        return y.astype(jnp.bfloat16)

    # First (latent -> hidden) block.
    h = block(x_ref[...], w0_ref[...], b0_ref[...])

    # Shared-weight hidden blocks: weights/bias read once; bias broadcast
    # hoisted out of the loop (JAX does not CSE broadcast_in_dim).
    wf = wf_ref[...]
    bf_b = jnp.broadcast_to(bf_ref[...], (h.shape[0], bf_ref.shape[1]))

    def shared_block(hh):
        return block(hh, wf, bf_b)

    if n_shared <= 4:
        for _ in range(n_shared):        # short static unroll
            h = shared_block(h)
    else:
        h = lax.fori_loop(0, n_shared, lambda _, hh: shared_block(hh), h,
                          unroll=2)      # bounded live ranges for deep decoders

    # Final projection, no activation (f32 accumulate, f32 store).
    o_ref[...] = (
        jnp.dot(h, wo_ref[...], preferred_element_type=jnp.float32) + bo_ref[...]
    )


# ---------------------------------------------------------------------------
# Wrapper: pad to lane/sublane multiples, tile the batch, keep weights resident
# ---------------------------------------------------------------------------
@functools.partial(
    jax.jit, static_argnames=("n_hidden_layers", "input_dim", "block_n")
)
def vidr_decoder_forward(latent_rep, folded, n_hidden_layers, input_dim,
                         block_n=512):
    n, latent_dim = latent_rep.shape
    latent_pad, hidden_pad = folded["w0"].shape
    input_pad = folded["wo"].shape[1]
    n_shared = n_hidden_layers - 1

    # Batch tile: multiple of 8 sublanes.  For non-toy batches make sure the
    # grid has at least 2 tiles so a dual-TensorCore part (v7x) / megacore can
    # split the "parallel" batch axis.
    tn = min(block_n, _round_up(n, SUBLANE))
    if n >= 2 * SUBLANE and _round_up(n, tn) // tn < 2:
        tn = _round_up(pl.cdiv(_round_up(n, SUBLANE), 2), SUBLANE)
    n_pad = _round_up(n, tn)

    # Zero-pad activations (bf16) to padded batch/feature sizes.  Padded
    # columns stay zero through every layer because the padded weight rows /
    # cols and biases are zero; padded rows are sliced off at the end.
    x = jnp.pad(latent_rep.astype(jnp.bfloat16),
                ((0, n_pad - n), (0, latent_pad - latent_dim)))

    # Constant-index, single-buffered specs -> weights resident in VMEM once.
    def resident(shape):
        return pl.BlockSpec(shape, lambda i: (0, 0),
                            pipeline_mode=pl.Buffered(1))

    # VMEM budget: single-buffered weights + biases, double-buffered x/out
    # tiles, f32 intermediate h (+ slack), plus headroom.
    weight_bytes = 2 * (latent_pad * hidden_pad
                        + hidden_pad * hidden_pad
                        + hidden_pad * input_pad)            # bf16
    bias_bytes = 4 * (2 * hidden_pad + input_pad)            # f32
    io_bytes = 2 * tn * (2 * latent_pad + 4 * input_pad)     # 2x (x bf16 + out f32)
    h_bytes = 2 * tn * hidden_pad * 4                        # f32 intermediates
    vmem_limit = weight_bytes + bias_bytes + io_bytes + h_bytes + (8 << 20)
    vmem_limit = min(max(vmem_limit, 32 << 20), 64 << 20)

    flops = 2 * n_pad * (latent_pad * hidden_pad
                         + n_shared * hidden_pad * hidden_pad
                         + hidden_pad * input_pad)
    bytes_accessed = (x.size * 2 + weight_bytes + bias_bytes
                      + n_pad * input_pad * 4)

    out = pl.pallas_call(
        functools.partial(decoder_kernel, n_shared=n_shared),
        out_shape=jax.ShapeDtypeStruct((n_pad, input_pad), jnp.float32),
        grid=(pl.cdiv(n_pad, tn),),
        in_specs=[
            pl.BlockSpec((tn, latent_pad), lambda i: (i, 0)),   # x tile
            resident(folded["w0"].shape),                       # weights / biases:
            resident(folded["b0"].shape),                       # constant index,
            resident(folded["wf"].shape),                       # single-buffered,
            resident(folded["bf"].shape),                       # VMEM-resident
            resident(folded["wo"].shape),
            resident(folded["bo"].shape),
        ],
        out_specs=pl.BlockSpec((tn, input_pad), lambda i: (i, 0)),
        compiler_params=pltpu.CompilerParams(
            dimension_semantics=("parallel",),
            vmem_limit_bytes=vmem_limit,
        ),
        cost_estimate=pl.CostEstimate(
            flops=flops, transcendentals=0, bytes_accessed=bytes_accessed),
    )(x, folded["w0"], folded["b0"], folded["wf"], folded["bf"],
      folded["wo"], folded["bo"])

    # Slice away batch padding and the zero-padded output lanes.
    return out[:n, :input_dim]


# ---------------------------------------------------------------------------
# Parameter construction (deterministic, synthetic)
# ---------------------------------------------------------------------------
def make_params(key, input_dim, latent_dim, hidden_dim):
    """Raw (unfolded) params mirroring the nn.Module. Weights are [D_in, D_out]."""
    keys = jax.random.split(key, 8)

    def lin(kw, kb, d_in, d_out):
        w = jax.random.normal(kw, (d_in, d_out), jnp.float32) * 0.1
        b = jax.random.normal(kb, (1, d_out), jnp.float32) * 0.1
        return w, b

    def bn(k, d):
        kg, kb, km, kv = jax.random.split(k, 4)
        gamma = 1.0 + 0.1 * jax.random.normal(kg, (1, d), jnp.float32)
        beta = 0.1 * jax.random.normal(kb, (1, d), jnp.float32)
        running_mean = 0.1 * jax.random.normal(km, (1, d), jnp.float32)
        running_var = 1.0 + 0.1 * jax.random.uniform(kv, (1, d), jnp.float32)
        scale = gamma / jnp.sqrt(running_var + BN_EPS)
        shift = beta - running_mean * scale
        return scale, shift

    w0, b0 = lin(keys[0], keys[1], latent_dim, hidden_dim)   # first block linear
    s0, t0 = bn(keys[2], hidden_dim)                         # first block BN
    wf, bf = lin(keys[3], keys[4], hidden_dim, hidden_dim)   # shared fclayers linear
    sf, tf = bn(keys[5], hidden_dim)                         # shared fclayers BN
    wo, bo = lin(keys[6], keys[7], hidden_dim, input_dim)    # final linear

    return dict(w0=w0, b0=b0, s0=s0, t0=t0,
                wf=wf, bf=bf, sf=sf, tf=tf,
                wo=wo, bo=bo)


def fold_and_pad_params(params, input_dim, latent_dim, hidden_dim):
    """Fold BN into (W, b); weights -> bf16, biases -> f32; pad to 128 lanes."""
    latent_pad = _round_up(latent_dim, LANE)
    hidden_pad = _round_up(hidden_dim, LANE)
    input_pad = _round_up(input_dim, LANE)

    def fold(w, b, scale, shift):
        # (x @ W + b) * scale + shift  ==  x @ (W*scale) + (b*scale + shift)
        return w * scale, b * scale + shift

    def pad2(a, rows, cols, dtype):
        out = jnp.zeros((rows, cols), dtype)
        return out.at[: a.shape[0], : a.shape[1]].set(a.astype(dtype))

    w0, b0 = fold(params["w0"], params["b0"], params["s0"], params["t0"])
    wf, bf = fold(params["wf"], params["bf"], params["sf"], params["tf"])
    wo, bo = params["wo"], params["bo"]

    return dict(
        w0=pad2(w0, latent_pad, hidden_pad, jnp.bfloat16),
        b0=pad2(b0, 1, hidden_pad, jnp.float32),
        wf=pad2(wf, hidden_pad, hidden_pad, jnp.bfloat16),
        bf=pad2(bf, 1, hidden_pad, jnp.float32),
        wo=pad2(wo, hidden_pad, input_pad, jnp.bfloat16),
        bo=pad2(bo, 1, input_pad, jnp.float32),
    )


# ---------------------------------------------------------------------------
# Pure-JAX reference (f32, unfolded BN) for sanity check
# ---------------------------------------------------------------------------
def reference_forward(latent_rep, params, n_hidden_layers):
    def block(x, w, b, s, t):
        y = (x @ w + b) * s + t
        return jnp.where(y >= 0, y, LEAKY_SLOPE * y)

    h = block(latent_rep, params["w0"], params["b0"], params["s0"], params["t0"])
    for _ in range(n_hidden_layers - 1):
        h = block(h, params["wf"], params["bf"], params["sf"], params["tf"])
    return h @ params["wo"] + params["bo"]


if __name__ == "__main__":
    # Small shapes consistent with the module: latent_rep is [batch, latent_dim]
    batch = 8
    input_dim = 16
    latent_dim = 8
    hidden_dim = 32
    n_hidden_layers = 3

    key = jax.random.PRNGKey(0)
    k_param, k_data = jax.random.split(key)

    params = make_params(k_param, input_dim, latent_dim, hidden_dim)
    folded = fold_and_pad_params(params, input_dim, latent_dim, hidden_dim)
    latent_rep = jax.random.normal(k_data, (batch, latent_dim), jnp.float32)

    x_hat = vidr_decoder_forward(
        latent_rep, folded, n_hidden_layers=n_hidden_layers, input_dim=input_dim
    )
    x_hat = jax.block_until_ready(x_hat)

    ref = reference_forward(latent_rep, params, n_hidden_layers)
    assert x_hat.shape == (batch, input_dim), x_hat.shape
    # bf16 matmuls -> looser tolerance than the f32 debug path.
    assert jnp.allclose(x_hat, ref, atol=3e-2, rtol=3e-2), "mismatch vs reference"

    print("KERNEL_OK")
</pallas_src>

<mosaic_0001>
module attributes {stable_mosaic.version = 11 : i64} {
  func.func @decoder_kernel(%arg0: i32, %arg1: memref<8x128xbf16, #tpu.memory_space<vmem>>, %arg2: memref<128x128xbf16, #tpu.memory_space<vmem>>, %arg3: memref<1x128xf32, #tpu.memory_space<vmem>>, %arg4: memref<128x128xbf16, #tpu.memory_space<vmem>>, %arg5: memref<1x128xf32, #tpu.memory_space<vmem>>, %arg6: memref<128x128xbf16, #tpu.memory_space<vmem>>, %arg7: memref<1x128xf32, #tpu.memory_space<vmem>>, %arg8: memref<8x128xf32, #tpu.memory_space<vmem>>) attributes {dimension_semantics = [#tpu.dimension_semantics<parallel>], iteration_bounds = array<i64: 1>, scalar_prefetch = 0 : i64, scratch_operands = 0 : i64, tpu.core_type = #tpu.core_type<tc>, window_params = [{transform_indices = @transform_0, window_bounds = array<i64: 8, 128>}, {pipeline_mode = #tpu.pipeline_mode<synchronous>, transform_indices = @transform_1, window_bounds = array<i64: 128, 128>}, {pipeline_mode = #tpu.pipeline_mode<synchronous>, transform_indices = @transform_2, window_bounds = array<i64: 1, 128>}, {pipeline_mode = #tpu.pipeline_mode<synchronous>, transform_indices = @transform_3, window_bounds = array<i64: 128, 128>}, {pipeline_mode = #tpu.pipeline_mode<synchronous>, transform_indices = @transform_4, window_bounds = array<i64: 1, 128>}, {pipeline_mode = #tpu.pipeline_mode<synchronous>, transform_indices = @transform_5, window_bounds = array<i64: 128, 128>}, {pipeline_mode = #tpu.pipeline_mode<synchronous>, transform_indices = @transform_6, window_bounds = array<i64: 1, 128>}, {transform_indices = @transform_7, window_bounds = array<i64: 8, 128>}]} {
    %c0 = arith.constant 0 : index
    %c0_0 = arith.constant 0 : index
    %0 = vector.load %arg1[%c0, %c0_0] : memref<8x128xbf16, #tpu.memory_space<vmem>>, vector<8x128xbf16>
    %c0_1 = arith.constant 0 : index
    %c0_2 = arith.constant 0 : index
    %1 = vector.load %arg2[%c0_1, %c0_2] : memref<128x128xbf16, #tpu.memory_space<vmem>>, vector<128x128xbf16>
    %c0_3 = arith.constant 0 : index
    %c0_4 = arith.constant 0 : index
    %2 = vector.load %arg3[%c0_3, %c0_4] : memref<1x128xf32, #tpu.memory_space<vmem>>, vector<1x128xf32>
    %cst = arith.constant dense<0.000000e+00> : vector<8x128xf32>
    %3 = tpu.matmul %0, %1, %cst {dimension_numbers = #tpu.dot_dimension_numbers<[1], [0], [0], [1], [0, 0, 1, 1], [], []>} : vector<8x128xbf16>, vector<128x128xbf16>, vector<8x128xf32> -> vector<8x128xf32>
    %4 = vector.broadcast %2 : vector<1x128xf32> to vector<8x128xf32>
    %5 = arith.addf %3, %4 : vector<8x128xf32>
    %cst_5 = arith.constant 0.00999999977 : f32
    %6 = vector.broadcast %cst_5 : f32 to vector<8x128xf32>
    %7 = arith.mulf %6, %5 : vector<8x128xf32>
    %8 = arith.maximumf %5, %7 : vector<8x128xf32>
    %9 = arith.truncf %8 : vector<8x128xf32> to vector<8x128xbf16>
    %c0_6 = arith.constant 0 : index
    %c0_7 = arith.constant 0 : index
    %10 = vector.load %arg4[%c0_6, %c0_7] : memref<128x128xbf16, #tpu.memory_space<vmem>>, vector<128x128xbf16>
    %c0_8 = arith.constant 0 : index
    %c0_9 = arith.constant 0 : index
    %11 = vector.load %arg5[%c0_8, %c0_9] : memref<1x128xf32, #tpu.memory_space<vmem>>, vector<1x128xf32>
    %12 = vector.shape_cast %11 : vector<1x128xf32> to vector<1x128xf32>
    %13 = vector.broadcast %12 : vector<1x128xf32> to vector<8x128xf32>
    %cst_10 = arith.constant dense<0.000000e+00> : vector<8x128xf32>
    %14 = tpu.matmul %9, %10, %cst_10 {dimension_numbers = #tpu.dot_dimension_numbers<[1], [0], [0], [1], [0, 0, 1, 1], [], []>} : vector<8x128xbf16>, vector<128x128xbf16>, vector<8x128xf32> -> vector<8x128xf32>
    %15 = arith.addf %14, %13 : vector<8x128xf32>
    %cst_11 = arith.constant 0.00999999977 : f32
    %16 = vector.broadcast %cst_11 : f32 to vector<8x128xf32>
    %17 = arith.mulf %16, %15 : vector<8x128xf32>
    %18 = arith.maximumf %15, %17 : vector<8x128xf32>
    %19 = arith.truncf %18 : vector<8x128xf32> to vector<8x128xbf16>
    %cst_12 = arith.constant dense<0.000000e+00> : vector<8x128xf32>
    %20 = tpu.matmul %19, %10, %cst_12 {dimension_numbers = #tpu.dot_dimension_numbers<[1], [0], [0], [1], [0, 0, 1, 1], [], []>} : vector<8x128xbf16>, vector<128x128xbf16>, vector<8x128xf32> -> vector<8x128xf32>
    %21 = arith.addf %20, %13 : vector<8x128xf32>
    %cst_13 = arith.constant 0.00999999977 : f32
    %22 = vector.broadcast %cst_13 : f32 to vector<8x128xf32>
    %23 = arith.mulf %22, %21 : vector<8x128xf32>
    %24 = arith.maximumf %21, %23 : vector<8x128xf32>
    %25 = arith.truncf %24 : vector<8x128xf32> to vector<8x128xbf16>
    %c0_14 = arith.constant 0 : index
    %c0_15 = arith.constant 0 : index
    %26 = vector.load %arg6[%c0_14, %c0_15] : memref<128x128xbf16, #tpu.memory_space<vmem>>, vector<128x128xbf16>
    %cst_16 = arith.constant dense<0.000000e+00> : vector<8x128xf32>
    %27 = tpu.matmul %25, %26, %cst_16 {dimension_numbers = #tpu.dot_dimension_numbers<[1], [0], [0], [1], [0, 0, 1, 1], [], []>} : vector<8x128xbf16>, vector<128x128xbf16>, vector<8x128xf32> -> vector<8x128xf32>
    %c0_17 = arith.constant 0 : index
    %c0_18 = arith.constant 0 : index
    %28 = vector.load %arg7[%c0_17, %c0_18] : memref<1x128xf32, #tpu.memory_space<vmem>>, vector<1x128xf32>
    %29 = vector.broadcast %28 : vector<1x128xf32> to vector<8x128xf32>
    %30 = arith.addf %27, %29 : vector<8x128xf32>
    %c0_19 = arith.constant 0 : index
    %c0_20 = arith.constant 0 : index
    %31 = vector.load %arg8[%c0_19, %c0_20] : memref<8x128xf32, #tpu.memory_space<vmem>>, vector<8x128xf32>
    tpu.vector_store %arg8[%c0_19, %c0_20], %30 {strides = array<i32>} : memref<8x128xf32, #tpu.memory_space<vmem>>, vector<8x128xf32>,
    return
  }
  func.func @transform_0(%arg0: i32) -> (i32, i32) {
    %c0_i32 = arith.constant 0 : i32
    %c0_i32_0 = arith.constant 0 : i32
    return %arg0, %c0_i32 : i32, i32
  }
  func.func @transform_1(%arg0: i32) -> (i32, i32) {
    %c0_i32 = arith.constant 0 : i32
    %c0_i32_0 = arith.constant 0 : i32
    %c0_i32_1 = arith.constant 0 : i32
    return %c0_i32, %c0_i32_0 : i32, i32
  }
  func.func @transform_2(%arg0: i32) -> (i32, i32) {
    %c0_i32 = arith.constant 0 : i32
    %c0_i32_0 = arith.constant 0 : i32
    %c0_i32_1 = arith.constant 0 : i32
    return %c0_i32, %c0_i32_0 : i32, i32
  }
  func.func @transform_3(%arg0: i32) -> (i32, i32) {
    %c0_i32 = arith.constant 0 : i32
    %c0_i32_0 = arith.constant 0 : i32
    %c0_i32_1 = arith.constant 0 : i32
    return %c0_i32, %c0_i32_0 : i32, i32
  }
  func.func @transform_4(%arg0: i32) -> (i32, i32) {
    %c0_i32 = arith.constant 0 : i32
    %c0_i32_0 = arith.constant 0 : i32
    %c0_i32_1 = arith.constant 0 : i32
    return %c0_i32, %c0_i32_0 : i32, i32
  }
  func.func @transform_5(%arg0: i32) -> (i32, i32) {
    %c0_i32 = arith.constant 0 : i32
    %c0_i32_0 = arith.constant 0 : i32
    %c0_i32_1 = arith.constant 0 : i32
    return %c0_i32, %c0_i32_0 : i32, i32
  }
  func.func @transform_6(%arg0: i32) -> (i32, i32) {
    %c0_i32 = arith.constant 0 : i32
    %c0_i32_0 = arith.constant 0 : i32
    %c0_i32_1 = arith.constant 0 : i32
    return %c0_i32, %c0_i32_0 : i32, i32
  }
  func.func @transform_7(%arg0: i32) -> (i32, i32) {
    %c0_i32 = arith.constant 0 : i32
    %c0_i32_0 = arith.constant 0 : i32
    return %arg0, %c0_i32 : i32, i32
  }
}

</mosaic_0001>

<bundles_post_ra>
// kernel: vidr_decoder_forward.1
= control target key start
LH: loop header
LB: loop body
LE: loop exit
PB: predicated region body
PF: predicated region fallthrough
CT: control target
= control target key end

     0   :  { %12 = vsyncpa [#allocation3], 0  ;;  %s902_s0 = inlined_call_operand.vmem [shape: bf16[8,128], index: 0, kind: input, shape index: {}]   ;;  %s903_s1 = inlined_call_operand.hbm [shape: bf16[128,128], index: 1, kind: input, shape index: {}]   ;;  %s904_s2 = inlined_call_operand.vmem [shape: f32[1,128], index: 2, kind: input, shape index: {}]   ;;  %s905_s3 = inlined_call_operand.hbm [shape: bf16[128,128], index: 3, kind: input, shape index: {}]   ;;  %s906_s4 = inlined_call_operand.vmem [shape: f32[1,128], index: 4, kind: input, shape index: {}]   ;;  %s907_s5 = inlined_call_operand.hbm [shape: bf16[128,128], index: 5, kind: input, shape index: {}]   ;;  %s908_s6 = inlined_call_operand.vmem [shape: f32[1,128], index: 6, kind: input, shape index: {}]   ;;  %s909_s7 = inlined_call_operand.hbm [shape: f32[8,128], index: 7, kind: output, shape index: {}]  }
   0x1   :  { %13 = vsyncpa [#allocation6], 0 }
   0x2   :  { %14 = vsyncpa [#allocation4], 0  ;;  %s738_s24 = smov [#allocation5]   ;;  %s739_s26 = smov [#allocation2]  }
   0x3   :  { %s36_s25 = sshll.u32 %s738_s24, 4  ;;  %s22_s27 = sshll.u32 %s739_s26, 4  ;;  %s37_s25 = int_to_ptr.vmem [resolvable:$true] %s36_s25  ;;  %s786_s27 = int_to_ptr.vmem [resolvable:$true] %s22_s27 }
   0x4   :  { %s644_s30 = scalar_lea.hbm %s905_s3, 1024 }
   0x5   :  { %p645_p0 = scmp.ne.s32.totalorder %s905_s3, %s644_s30  ;;  %p648_p1 = scmp.lt.u32.totalorder %s644_s30, %s905_s3 }
   0x7   :  { %p650_p2 = pnand %p648_p1, %p645_p0 }
   0x9   :  { %653 = shalt.err (!%p650_p2)
}
   0xa   :  { %s654_s12 = scalar_lea.vmem %s37_s25, 1024  ;;  %p659_p4 = scmp.lt.s32.totalorder %s37_s25, %s37_s25 }
   0xb   :  { %p655_p3 = scmp.ne.s32.totalorder %s37_s25, %s654_s12  ;;  %p660_p5 = scmp.lt.s32.totalorder %s654_s12, %s654_s12 }
   0xd   :  { %p661_p6 = por %p660_p5, %p659_p4 }
   0xf   :  { %p662_p7 = pnand %p661_p6, %p655_p3 }
  0x11   :  { %665 = shalt.err (!%p662_p7)
}
  0x12   :  { %s740_s13 = smov 64   ;;  %s741_s14 = smov 4  }
  0x13   :  { %42 = dma.hbm_to_vmem [thread:$0]  %s905_s3, 1024, %s37_s25, [#allocation6], %s740_s13, %s740_s13, %s741_s14  }
  0x14   :  { %s666_s19 = scalar_lea.hbm %s903_s1, 1024 }
  0x15   :  { %p667_p8 = scmp.ne.s32.totalorder %s903_s1, %s666_s19  ;;  %p670_p9 = scmp.lt.u32.totalorder %s666_s19, %s903_s1 }
  0x17   :  { %p672_p10 = pnand %p670_p9, %p667_p8 }
  0x19   :  { %675 = shalt.err (!%p672_p10)
}
  0x1a   :  { %s676_s24 = scalar_lea.vmem %s786_s27, 1024  ;;  %p681_p12 = scmp.lt.s32.totalorder %s786_s27, %s786_s27 }
  0x1b   :  { %p677_p11 = scmp.ne.s32.totalorder %s786_s27, %s676_s24  ;;  %p682_p13 = scmp.lt.s32.totalorder %s676_s24, %s676_s24 }
  0x1d   :  { %p683_p0 = por %p682_p13, %p681_p12 }
  0x1f   :  { %p684_p1 = pnand %p683_p0, %p677_p11 }
  0x21   :  { %687 = shalt.err (!%p684_p1)
}
  0x22   :  { %28 = dma.hbm_to_vmem [thread:$0]  %s903_s1, 1024, %s786_s27, [#allocation3], %s740_s13, %s740_s13, %s741_s14  }
  0x23   :  { %s742_s26 = smov [#allocation7]   ;;  %s688_s8 = scalar_lea.hbm %s907_s5, 1024 }
  0x24   :  { %s50_s28 = sshll.u32 %s742_s26, 4  ;;  %p689_p2 = scmp.ne.s32.totalorder %s907_s5, %s688_s8  ;;  %s51_s28 = int_to_ptr.vmem [resolvable:$true] %s50_s28 }
  0x25   :  { %p692_p3 = scmp.lt.u32.totalorder %s688_s8, %s907_s5 }
  0x27   :  { %p694_p4 = pnand %p692_p3, %p689_p2 }
  0x29   :  { %697 = shalt.err (!%p694_p4)
}
  0x2a   :  { %s698_s15 = scalar_lea.vmem %s51_s28, 1024  ;;  %p703_p6 = scmp.lt.s32.totalorder %s51_s28, %s51_s28 }
  0x2b   :  { %p699_p5 = scmp.ne.s32.totalorder %s51_s28, %s698_s15  ;;  %p704_p7 = scmp.lt.s32.totalorder %s698_s15, %s698_s15 }
  0x2d   :  { %p705_p8 = por %p704_p7, %p703_p6 }
  0x2f   :  { %p706_p9 = pnand %p705_p8, %p699_p5 }
  0x31   :  { %709 = shalt.err (!%p706_p9)
}
  0x32   :  { %56 = dma.hbm_to_vmem [thread:$0]  %s907_s5, 1024, %s51_s28, [#allocation6], %s740_s13, %s740_s13, %s741_s14  }
  0x33   :  { %732 = dma.done.wait [#allocation3], 1024  }
  0x34   :  { %733 = vsyncadd [#allocation3], 4294966272 }
  0x35   :  { %734 = dma.done.wait [#allocation6], 2048  }
  0x36   :  { %735 = vsyncadd [#allocation6], 4294965248  ;;  %v743_v0 = vmov 0.0   ;;  %vm744_vm0 = vmmov 0   ;;  %v620_v1 = vld [vmem:[#allocation2] sm:$0xff]   ;;  %v621_v2 = vld [vmem:[#allocation2 + $0x8] sm:$0xff]  }
  0x37   :  { %532 = vmatprep.subr.bf16.mxu0 %v743_v0  ;;  %548 = vmatprep.mubr.msk.bf16.mxu0 %vm744_vm0, %v743_v0  ;;  %v622_v3 = vld [vmem:[#allocation2 + $0x10] sm:$0xff]   ;;  %v628_v4 = vld [vmem:[#allocation5] sm:$0xff]   ;;  %v623_v5 = vld [vmem:[#allocation2 + $0x18] sm:$0xff]   ;;  %s745_s18 = smov [#allocation8]  }
  0x38   :  { %552 = vmatprep.subr.bf16.mxu1 %v743_v0  ;;  %568 = vmatprep.mubr.msk.bf16.mxu1 %vm744_vm0, %v743_v0  ;;  %v629_v6 = vld [vmem:[#allocation5 + $0x8] sm:$0xff]   ;;  %v624_v7 = vld [vmem:[#allocation2 + $0x20] sm:$0xff]   ;;  %v630_v8 = vld [vmem:[#allocation5 + $0x10] sm:$0xff]   ;;  %s459_s19 = sshll.u32 %s745_s18, 4  ;;  %s460_s19 = int_to_ptr.vmem [resolvable:$true] %s459_s19 }
  0x39   :  { %533 = vmatpush3.bf16.msra.mxu0 %v620_v1  ;;  %553 = vmatpush3.bf16.msra.mxu1 %v628_v4  ;;  %v625_v9 = vld [vmem:[#allocation2 + $0x28] sm:$0xff]   ;;  %v631_v10 = vld [vmem:[#allocation5 + $0x18] sm:$0xff]   ;;  %v626_v11 = vld [vmem:[#allocation2 + $0x30] sm:$0xff]   ;;  %s710_s20 = scalar_lea.vmem %s460_s19, 128  ;;  %p715_p11 = scmp.lt.s32.totalorder %s460_s19, %s460_s19 }
  0x3a   :  { %534 = vmatprep.subr.bf16.mxu0 %v743_v0  ;;  %554 = vmatprep.subr.bf16.mxu1 %v743_v0  ;;  %v632_v12 = vld [vmem:[#allocation5 + $0x20] sm:$0xff]   ;;  %v627_v13 = vld [vmem:[#allocation2 + $0x38] sm:$0xff]   ;;  %v633_v14 = vld [vmem:[#allocation5 + $0x28] sm:$0xff]   ;;  %p711_p10 = scmp.ne.s32.totalorder %s460_s19, %s710_s20  ;;  %p716_p12 = scmp.lt.s32.totalorder %s710_s20, %s710_s20 }
  0x3b   :  { %v69_v15 = vld [vmem:[%s902_s0] sm:$0xf]  ;;  %v634_v16 = vld [vmem:[#allocation5 + $0x30] sm:$0xff]   ;;  %v635_v17 = vld [vmem:[#allocation5 + $0x38] sm:$0xff]  }
  0x3c   :  { %v469_v18 = vld [vmem:[%s904_s2] ss:$0 sm:$0xff]  ;;  %v637_v28 = vld [vmem:[#allocation7 + $0x8] sm:$0xff]   ;;  %v638_v29 = vld [vmem:[#allocation7 + $0x10] sm:$0xff]   ;;  %p717_p13 = por %p716_p12, %p715_p11 }
  0x3d   :  { %535 = vmatpush3.bf16.msra.mxu0 %v621_v2  ;;  %555 = vmatpush3.bf16.msra.mxu1 %v629_v6  ;;  %v636_v27 = vld [vmem:[#allocation7] sm:$0xff]   ;;  %v639_v30 = vld [vmem:[#allocation7 + $0x18] sm:$0xff]   ;;  %v641_v32 = vld [vmem:[#allocation7 + $0x28] sm:$0xff]  }
  0x3e   :  { %536 = vmatprep.subr.bf16.mxu0 %v743_v0  ;;  %556 = vmatprep.subr.bf16.mxu1 %v743_v0  ;;  %v640_v31 = vld [vmem:[#allocation7 + $0x20] sm:$0xff]   ;;  %v642_v42 = vld [vmem:[#allocation7 + $0x30] sm:$0xff]   ;;  %v643_v43 = vld [vmem:[#allocation7 + $0x38] sm:$0xff]   ;;  %p718_p0 = pnand %p717_p13, %p711_p10 }
  0x3f   :  { %v478_v33 = vld [vmem:[%s906_s4] ss:$0 sm:$0xff] }
  0x40   :  { %v487_v52 = vld [vmem:[%s908_s6] ss:$0 sm:$0xff] }
  0x41   :  { %537 = vmatpush3.bf16.msra.mxu0 %v622_v3  ;;  %557 = vmatpush3.bf16.msra.mxu1 %v630_v8 }
  0x42   :  { %538 = vmatprep.subr.bf16.mxu0 %v743_v0  ;;  %558 = vmatprep.subr.bf16.mxu1 %v743_v0 }
  0x45   :  { %539 = vmatpush3.bf16.msra.mxu0 %v623_v5  ;;  %559 = vmatpush3.bf16.msra.mxu1 %v631_v10 }
  0x46   :  { %540 = vmatprep.subr.bf16.mxu0 %v743_v0  ;;  %560 = vmatprep.subr.bf16.mxu1 %v743_v0 }
  0x49   :  { %541 = vmatpush3.bf16.msra.mxu0 %v624_v7  ;;  %561 = vmatpush3.bf16.msra.mxu1 %v632_v12 }
  0x4a   :  { %542 = vmatprep.subr.bf16.mxu0 %v743_v0  ;;  %562 = vmatprep.subr.bf16.mxu1 %v743_v0 }
  0x4d   :  { %543 = vmatpush3.bf16.msra.mxu0 %v625_v9  ;;  %563 = vmatpush3.bf16.msra.mxu1 %v633_v14 }
  0x4e   :  { %544 = vmatprep.subr.bf16.mxu0 %v743_v0  ;;  %564 = vmatprep.subr.bf16.mxu1 %v743_v0 }
  0x51   :  { %545 = vmatpush3.bf16.msra.mxu0 %v626_v11  ;;  %565 = vmatpush3.bf16.msra.mxu1 %v634_v16 }
  0x52   :  { %546 = vmatprep.subr.bf16.mxu0 %v743_v0  ;;  %566 = vmatprep.subr.bf16.mxu1 %v743_v0 }
  0x55   :  { %547 = vmatpush3.bf16.msra.mxu0 %v627_v13  ;;  %567 = vmatpush3.bf16.msra.mxu1 %v635_v17 }
  0x56   :  { %572 = vmatprep.subr.bf16.mxu0 %v743_v0  ;;  %592 = vmatprep.subr.bf16.mxu1 %v743_v0 }
  0x58   :  { %549 = vmatmul.mubr.bf16.vlgmr.msra.gmra.mrb[0].mxu0 %v69_v15 }
  0x59   :  { %573 = vmatpush3.bf16.msra.mxu0 %v628_v4  ;;  %588 = vmatprep.mubr.msk.bf16.mxu0 %vm744_vm0, %v743_v0 }
  0x5a   :  { %574 = vmatprep.subr.bf16.mxu0 %v743_v0 }
  0x5d   :  { %575 = vmatpush3.bf16.msra.mxu0 %v629_v6 }
  0x5e   :  { %576 = vmatprep.subr.bf16.mxu0 %v743_v0 }
  0x61   :  { %577 = vmatpush3.bf16.msra.mxu0 %v630_v8 }
  0x62   :  { %578 = vmatprep.subr.bf16.mxu0 %v743_v0 }
  0x65   :  { %579 = vmatpush3.bf16.msra.mxu0 %v631_v10 }
  0x66   :  { %580 = vmatprep.subr.bf16.mxu0 %v743_v0 }
  0x69   :  { %581 = vmatpush3.bf16.msra.mxu0 %v632_v12 }
  0x6a   :  { %582 = vmatprep.subr.bf16.mxu0 %v743_v0 }
  0x6d   :  { %583 = vmatpush3.bf16.msra.mxu0 %v633_v14 }
  0x6e   :  { %584 = vmatprep.subr.bf16.mxu0 %v743_v0 }
  0x71   :  { %585 = vmatpush3.bf16.msra.mxu0 %v634_v16 }
  0x72   :  { %586 = vmatprep.subr.bf16.mxu0 %v743_v0 }
  0x75   :  { %587 = vmatpush3.bf16.msra.mxu0 %v635_v17 }
 0x12b   :  { %v175_v19 = vpop.f32.mrb[0].mxu0 }
 0x12c   :  { %v176_v20 = vadd.f32 %v469_v18, %v175_v19  ;;  %v550_v21 = vpop.f32.mrb[1].mxu0 }
 0x12d   :  { %v178_v22 = vpop.f32.mrb[2].mxu0 }
 0x12e   :  { %v181_v23 = vmul.f32 0.01, %v176_v20  ;;  %v551_v24 = vpop.f32.mrb[3].mxu0 }
 0x130   :  { %v182_v25 = vmax.f32 %v176_v20, %v181_v23 }
 0x132   :  { %v183_v26 = vpack.c.bf16 %v182_v25, %v182_v25 }
 0x134   :  { %569 = vmatmul.mubr.bf16.vlgmr.msra.gmra.mrb[0].mxu1 %v183_v26 }
 0x135   :  { %608 = vmatprep.mubr.msk.bf16.mxu1 %vm744_vm0, %v743_v0  ;;  %593 = vmatpush3.bf16.msra.mxu1 %v636_v27 }
 0x136   :  { %594 = vmatprep.subr.bf16.mxu1 %v743_v0 }
 0x139   :  { %595 = vmatpush3.bf16.msra.mxu1 %v637_v28 }
 0x13a   :  { %596 = vmatprep.subr.bf16.mxu1 %v743_v0 }
 0x13d   :  { %597 = vmatpush3.bf16.msra.mxu1 %v638_v29 }
 0x13e   :  { %598 = vmatprep.subr.bf16.mxu1 %v743_v0 }
 0x141   :  { %599 = vmatpush3.bf16.msra.mxu1 %v639_v30 }
 0x142   :  { %600 = vmatprep.subr.bf16.mxu1 %v743_v0 }
 0x145   :  { %601 = vmatpush3.bf16.msra.mxu1 %v640_v31 }
 0x146   :  { %602 = vmatprep.subr.bf16.mxu1 %v743_v0 }
 0x149   :  { %603 = vmatpush3.bf16.msra.mxu1 %v641_v32 }
 0x14a   :  { %604 = vmatprep.subr.bf16.mxu1 %v743_v0 }
 0x14d   :  { %605 = vmatpush3.bf16.msra.mxu1 %v642_v42 }
 0x14e   :  { %606 = vmatprep.subr.bf16.mxu1 %v743_v0 }
 0x151   :  { %607 = vmatpush3.bf16.msra.mxu1 %v643_v43 }
 0x207   :  { %v289_v34 = vpop.f32.mrb[0].mxu1 }
 0x208   :  { %v290_v35 = vadd.f32 %v478_v33, %v289_v34  ;;  %v570_v36 = vpop.f32.mrb[1].mxu1 }
 0x209   :  { %v292_v37 = vpop.f32.mrb[2].mxu1 }
 0x20a   :  { %v295_v38 = vmul.f32 0.01, %v290_v35  ;;  %v571_v39 = vpop.f32.mrb[3].mxu1 }
 0x20c   :  { %v296_v40 = vmax.f32 %v290_v35, %v295_v38 }
 0x20e   :  { %v297_v41 = vpack.c.bf16 %v296_v40, %v296_v40 }
 0x210   :  { %589 = vmatmul.mubr.bf16.vlgmr.msra.gmra.mrb[4].mxu0 %v297_v41 }
 0x2e3   :  { %v332_v44 = vpop.f32.mrb[4].mxu0 }
 0x2e4   :  { %v333_v45 = vadd.f32 %v478_v33, %v332_v44  ;;  %v590_v46 = vpop.f32.mrb[5].mxu0 }
 0x2e5   :  { %v335_v47 = vpop.f32.mrb[6].mxu0 }
 0x2e6   :  { %v338_v48 = vmul.f32 0.01, %v333_v45  ;;  %v591_v49 = vpop.f32.mrb[7].mxu0 }
 0x2e8   :  { %v339_v50 = vmax.f32 %v333_v45, %v338_v48 }
 0x2ea   :  { %v340_v51 = vpack.c.bf16 %v339_v50, %v339_v50 }
 0x2ec   :  { %609 = vmatmul.mubr.bf16.vlgmr.msra.gmra.mrb[4].mxu1 %v340_v51 }
 0x3bf   :  { %v446_v53 = vpop.f32.mrb[4].mxu1 }
 0x3c0   :  { %v447_v54 = vadd.f32 %v487_v52, %v446_v53  ;;  %v610_v55 = vpop.f32.mrb[5].mxu1 }
 0x3c1   :  { %v449_v56 = vpop.f32.mrb[6].mxu1 }
 0x3c2   :  { %452 = vst [vmem:[#allocation8] sm:$0xff] %v447_v54  ;;  %v611_v57 = vpop.f32.mrb[7].mxu1 }
 0x3c3   :  { %721 = shalt.err (!%p718_p0)
}
 0x3c4   :  { %s722_s6 = scalar_lea.hbm %s909_s7, 128 }
 0x3c5   :  { %p723_p1 = scmp.ne.s32.totalorder %s909_s7, %s722_s6  ;;  %p726_p2 = scmp.lt.u32.totalorder %s722_s6, %s909_s7 }
 0x3c7   :  { %p728_p3 = pnand %p726_p2, %p723_p1 }
 0x3c9   :  { %731 = shalt.err (!%p728_p3)
}
 0x3ca   :  { %462 = dma.vmem_to_hbm [thread:$0]  %s460_s19, 128, %s909_s7, [#allocation4]  }
 0x3cb   :  { %736 = dma.done.wait [#allocation4], 128  }
 0x3cc   :  { %737 = vsyncadd [#allocation4], 4294967168 }
 0x3cd   :  { %466 = vsyncpa [#allocation3], 1 }
 0x3ce   :  { %467 = vsyncpa [#allocation6], 1 }
 0x3cf   :  { %468 = vsyncpa [#allocation4], 1 }

</bundles_post_ra>
